<compile_context>
chip_gen: v7x
topology: tpu7x:2x2x1
jax: 0.10.0
libtpu: 0.0.40
codegen_flags: <defaults>
</compile_context>

<pallas_src>
import jax
import jax.numpy as jnp
from jax.experimental import pallas as pl
from jax.experimental.pallas import tpu as pltpu


def _round_up(x, m):
    return (x + m - 1) // m * m


def _choose_row_tile(m, target=256, min_tile=128):
    """Pick a row tile (multiple of 8) over the padded token rows.

    Small extents use the whole (8-rounded) extent; large extents pick the tile in
    [min_tile, target] that minimizes padding so every tile is full (no masked MXU
    rows / masked stores)."""
    mp8 = _round_up(m, 8)
    if mp8 <= target:
        return mp8
    best_t, best_pad = None, None
    for t in range(target, min_tile - 1, -8):
        pad = _round_up(m, t) - m
        if best_pad is None or pad < best_pad:
            best_t, best_pad = t, pad
    return best_t


def vit_embed_kernel(tok_ref, w_ref, add_ref, out_ref):
    # tok_ref: (1, TM, Kp)  bf16  token-row tile (row 0 of the full array = zero cls slot)
    # w_ref:   (Kp, Dp)     bf16  patch-projection weight, VMEM-resident across the grid
    # add_ref: (TM, Dp)     f32   per-row additive term (pos + bias, or cls + pos[0] for row 0);
    #                             constant across the inner (batch) grid axis -> fetched once per row tile
    # out_ref: (1, TM, Dp)  out_dtype
    proj = jnp.dot(tok_ref[0], w_ref[...],
                   preferred_element_type=jnp.float32)          # MXU: bf16 in, f32 accumulate
    out_ref[0] = (proj + add_ref[...]).astype(out_ref.dtype)    # single fused epilogue add + store
    # TODO(synk): dropout is treated as identity (eval mode); training-mode dropout would use
    # pltpu.prng_seed / pltpu.prng_random_bits here.


def vit_embedding(x_nchw, conv_w, conv_b, cls_token, pos_embedding, patch_size,
                  *, row_tile=256, out_dtype=jnp.float32):
    """x_nchw: (B, C, H, W)  conv_w: (D, C, P, P)  conv_b: (D,)
    cls_token: (1, 1, D)  pos_embedding: (1, N+1, D)  ->  (B, N+1, D)"""
    B, C, H, W = x_nchw.shape
    P = patch_size
    Hp, Wp = H // P, W // P
    N = Hp * Wp
    D = conv_w.shape[0]
    K = C * P * P
    M = N + 1                       # +1 for the cls token row

    # --- tiling / padding choices (all tiles full, lane/sublane aligned) ---
    Dp = _round_up(D, 128)          # lane-dense output width
    Kp = _round_up(K, 128)          # 128-aligned contraction (full MXU passes, clean bf16 packing)
    TM = _choose_row_tile(M, row_tile)
    Mp = _round_up(M, TM)           # TM divides Mp exactly -> no ragged/masked last tile
    if B == 1 and Mp // TM == 1 and TM >= 16:
        # v7x has 2 TensorCores sharded over the parallel grid axes: guarantee >=2 grid
        # steps for single-image inference by splitting the row axis.
        TM = _round_up((TM + 1) // 2, 8)
        Mp = _round_up(M, TM)

    # --- glue: im2col in bf16 (cast first, so the transpose/pad pass moves half the bytes),
    # flattened in (C, P, P) order to match the flattened Conv2d weight.
    x_bf = x_nchw.astype(jnp.bfloat16)
    patches = x_bf.reshape(B, C, Hp, P, Wp, P).transpose(0, 2, 4, 1, 3, 5).reshape(B, N, K)
    # One pad builds: a zero cls slot at row 0 (0 @ W == 0; cls value arrives via `add`),
    # zero rows up to Mp, and zero columns up to Kp.
    tokens = jnp.pad(patches, ((0, 0), (1, Mp - M), (0, Kp - K)))

    # Projection weight (Kp, Dp) bf16 for the MXU (cast before transpose).
    # TODO(synk): if conv_w is static across calls, hoist this preprocessing out of the
    # per-forward path entirely.
    w2d = conv_w.astype(jnp.bfloat16).reshape(D, K).T
    w2d = jnp.pad(w2d, ((0, Kp - K), (0, Dp - D)))

    # Per-row additive term (f32):
    #   row 0    = cls_token + pos[0]        (batch-invariant cls row, hoisted out of the kernel)
    #   row 1..N = pos[1..N] + conv_bias     (bias fused -> one epilogue add per row)
    #   row N+1..= 0                          (padding rows, sliced off below)
    pos = pos_embedding.reshape(M, D).astype(jnp.float32)
    add = jnp.concatenate(
        [cls_token.reshape(1, D).astype(jnp.float32) + pos[0:1],
         pos[1:] + conv_b.reshape(1, D).astype(jnp.float32)], axis=0)
    add = jnp.pad(add, ((0, Mp - M), (0, Dp - D)))

    # Row-tile axis OUTER, batch INNER: `add`'s block index is constant across the inner
    # axis, so it is DMA'd once per row tile instead of once per grid step.
    grid = (Mp // TM, B)

    # Explicit VMEM budget (weight + double-buffered token/add/out tiles), clamped to be
    # safe on v7x's 64 MiB physical VMEM while comfortably above the 32 MiB scoped default.
    out_isize = jnp.dtype(out_dtype).itemsize
    vmem_needed = (Kp * Dp * 2                    # resident weight (bf16)
                   + 2 * (TM * Kp * 2)            # token tiles (bf16, double-buffered)
                   + 2 * (TM * Dp * 4)            # add tiles (f32)
                   + 2 * (TM * Dp * out_isize))   # output tiles
    vmem_limit = int(min(64 << 20, max(32 << 20, int(vmem_needed * 1.5))))

    out = pl.pallas_call(
        vit_embed_kernel,
        out_shape=jax.ShapeDtypeStruct((B, Mp, Dp), out_dtype),
        grid_spec=pltpu.PrefetchScalarGridSpec(
            num_scalar_prefetch=0,
            grid=grid,
            in_specs=[
                pl.BlockSpec((1, TM, Kp), lambda j, b: (b, j, 0)),   # token rows (bf16)
                pl.BlockSpec((Kp, Dp), lambda j, b: (0, 0)),         # weight (VMEM-resident)
                pl.BlockSpec((TM, Dp), lambda j, b: (j, 0)),         # pos/bias/cls add (f32)
            ],
            out_specs=pl.BlockSpec((1, TM, Dp), lambda j, b: (b, j, 0)),
        ),
        compiler_params=pltpu.CompilerParams(
            # Every grid step writes a disjoint output block -> both axes parallel
            # (megacore / 2-TC sharding on v7x).
            dimension_semantics=("parallel", "parallel"),
            vmem_limit_bytes=vmem_limit,
        ),
    )(tokens, w2d, add)

    if Mp != M or Dp != D:
        out = out[:, :M, :D]
    return out


def _reference(x_nchw, conv_w, conv_b, cls_token, pos_embedding, patch_size):
    """Pure-JAX f32 reference mirroring the PyTorch forward (eval mode)."""
    B, C, H, W = x_nchw.shape
    P = patch_size
    Hp, Wp = H // P, W // P
    N = Hp * Wp
    D = conv_w.shape[0]
    patches = x_nchw.reshape(B, C, Hp, P, Wp, P).transpose(0, 2, 4, 1, 3, 5)
    patches = patches.reshape(B, N, C * P * P)
    proj = jnp.einsum("bnk,dk->bnd", patches, conv_w.reshape(D, -1)) + conv_b
    cls = jnp.broadcast_to(cls_token, (B, 1, D))
    x = jnp.concatenate([cls, proj], axis=1)
    return x + pos_embedding


if __name__ == "__main__":
    # Small shapes consistent with the module: img=16, patch=4, C=4, D=32, B=2
    img_size, patch_size, in_channels, embed_dim = 16, 4, 4, 32
    B = 2
    num_patches = (img_size // patch_size) ** 2

    key = jax.random.PRNGKey(0)
    kx, kw, kb, kc, kp = jax.random.split(key, 5)

    x = jax.random.normal(kx, (B, in_channels, img_size, img_size), jnp.float32)
    conv_w = jax.random.normal(
        kw, (embed_dim, in_channels, patch_size, patch_size), jnp.float32) * 0.05
    conv_b = jax.random.normal(kb, (embed_dim,), jnp.float32) * 0.05
    cls_token = jax.random.normal(kc, (1, 1, embed_dim), jnp.float32) * 0.02
    pos_embedding = jax.random.normal(
        kp, (1, num_patches + 1, embed_dim), jnp.float32) * 0.02

    out = vit_embedding(x, conv_w, conv_b, cls_token, pos_embedding, patch_size)
    out = jax.block_until_ready(out)

    ref = _reference(x, conv_w, conv_b, cls_token, pos_embedding, patch_size)
    assert out.shape == (B, num_patches + 1, embed_dim), out.shape
    # bf16 MXU operands with f32 accumulation -> loosened tolerance vs the f32 reference.
    assert jnp.allclose(out, ref, atol=2e-2, rtol=2e-2), "mismatch vs reference"

    print("KERNEL_OK")
</pallas_src>

<mosaic_0001>
module attributes {stable_mosaic.version = 11 : i64} {
  func.func @vit_embed_kernel(%arg0: i32, %arg1: i32, %arg2: memref<1x24x128xbf16, #tpu.memory_space<vmem>>, %arg3: memref<128x128xbf16, #tpu.memory_space<vmem>>, %arg4: memref<24x128xf32, #tpu.memory_space<vmem>>, %arg5: memref<1x24x128xf32, #tpu.memory_space<vmem>>) attributes {dimension_semantics = [#tpu.dimension_semantics<parallel>, #tpu.dimension_semantics<parallel>], iteration_bounds = array<i64: 1, 2>, scalar_prefetch = 0 : i64, scratch_operands = 0 : i64, tpu.core_type = #tpu.core_type<tc>, window_params = [{transform_indices = @transform_0, window_bounds = array<i64: 1, 24, 128>}, {pipeline_mode = #tpu.pipeline_mode<synchronous>, transform_indices = @transform_1, window_bounds = array<i64: 128, 128>}, {transform_indices = @transform_2, window_bounds = array<i64: 24, 128>}, {transform_indices = @transform_3, window_bounds = array<i64: 1, 24, 128>}]} {
    %c0 = arith.constant 0 : index
    %c0_0 = arith.constant 0 : index
    %c0_1 = arith.constant 0 : index
    %0 = vector.load %arg2[%c0, %c0_0, %c0_1] : memref<1x24x128xbf16, #tpu.memory_space<vmem>>, vector<1x24x128xbf16>
    %1 = vector.shape_cast %0 : vector<1x24x128xbf16> to vector<24x128xbf16>
    %c0_2 = arith.constant 0 : index
    %c0_3 = arith.constant 0 : index
    %2 = vector.load %arg3[%c0_2, %c0_3] : memref<128x128xbf16, #tpu.memory_space<vmem>>, vector<128x128xbf16>
    %cst = arith.constant dense<0.000000e+00> : vector<24x128xf32>
    %3 = tpu.matmul %1, %2, %cst {dimension_numbers = #tpu.dot_dimension_numbers<[1], [0], [0], [1], [0, 0, 1, 1], [], []>} : vector<24x128xbf16>, vector<128x128xbf16>, vector<24x128xf32> -> vector<24x128xf32>
    %c0_4 = arith.constant 0 : index
    %c0_5 = arith.constant 0 : index
    %4 = vector.load %arg4[%c0_4, %c0_5] : memref<24x128xf32, #tpu.memory_space<vmem>>, vector<24x128xf32>
    %5 = arith.addf %3, %4 : vector<24x128xf32>
    %c0_6 = arith.constant 0 : index
    %c0_7 = arith.constant 0 : index
    %c0_8 = arith.constant 0 : index
    %6 = vector.load %arg5[%c0_6, %c0_7, %c0_8] : memref<1x24x128xf32, #tpu.memory_space<vmem>>, vector<1x24x128xf32>
    %7 = vector.shape_cast %6 : vector<1x24x128xf32> to vector<24x128xf32>
    %8 = vector.shape_cast %5 : vector<24x128xf32> to vector<1x24x128xf32>
    tpu.vector_store %arg5[%c0_6, %c0_7, %c0_8], %8 {strides = array<i32>} : memref<1x24x128xf32, #tpu.memory_space<vmem>>, vector<1x24x128xf32>,
    return
  }
  func.func @transform_0(%arg0: i32, %arg1: i32) -> (i32, i32, i32) {
    %c0_i32 = arith.constant 0 : i32
    %c0_i32_0 = arith.constant 0 : i32
    return %arg1, %arg0, %c0_i32 : i32, i32, i32
  }
  func.func @transform_1(%arg0: i32, %arg1: i32) -> (i32, i32) {
    %c0_i32 = arith.constant 0 : i32
    %c0_i32_0 = arith.constant 0 : i32
    %c0_i32_1 = arith.constant 0 : i32
    return %c0_i32, %c0_i32_0 : i32, i32
  }
  func.func @transform_2(%arg0: i32, %arg1: i32) -> (i32, i32) {
    %c0_i32 = arith.constant 0 : i32
    %c0_i32_0 = arith.constant 0 : i32
    return %arg0, %c0_i32 : i32, i32
  }
  func.func @transform_3(%arg0: i32, %arg1: i32) -> (i32, i32, i32) {
    %c0_i32 = arith.constant 0 : i32
    %c0_i32_0 = arith.constant 0 : i32
    return %arg1, %arg0, %c0_i32 : i32, i32, i32
  }
}

</mosaic_0001>

<bundles_post_ra>
// kernel: tpu_custom_call.1
= control target key start
LH: loop header
LB: loop body
LE: loop exit
PB: predicated region body
PF: predicated region fallthrough
CT: control target
= control target key end

     0   :  { %8 = vsyncpa [#allocation3], 0  ;;  %s1124_s0 = inlined_call_operand.hbm [shape: bf16[2,24,128], index: 0, kind: input, shape index: {}]   ;;  %s1125_s1 = inlined_call_operand.hbm [shape: bf16[128,128], index: 1, kind: input, shape index: {}]   ;;  %s1126_s2 = inlined_call_operand.hbm [shape: f32[24,128], index: 2, kind: input, shape index: {}]   ;;  %s1127_s3 = inlined_call_operand.hbm [shape: f32[2,24,128], index: 3, kind: output, shape index: {}]  }
   0x1   :  { %10 = vsyncpa [#allocation3 + $0x1], 0 }
   0x2   :  { %11 = vsyncpa [#allocation6], 0 }
   0x3   :  { %12 = vsyncpa [#allocation4], 0 }
   0x4   :  { %14 = vsyncpa [#allocation4 + $0x1], 0  ;;  %s864_s12 = smov 0   ;;  %s866_s13 = smov 0  }
   0x5   :  { %s868_s14 = smov 0   ;;  %s870_s15 = smov 0  }
   0x6   :  { %s872_s16 = smov 0   ;;  %s874_s17 = smov 0  }
   0x7 LB: > { %s503_s18 = sadd.s32 4294967295, %s832_s17   ;;  %s504_s19 = sadd.s32 4294967294, %s832_s17   ;;  %s832_s17 = sphi %s874_s17, %s20_s17   ;;  %s828_s16 = sphi %s872_s16, %s1149_s16   ;;  %s824_s15 = sphi %s870_s15, %s1148_s15   ;;  %s820_s14 = sphi %s868_s14, %s1147_s14   ;;  %s816_s13 = sphi %s866_s13, %s1146_s13   ;;  %s812_s12 = sphi %s864_s12, %s1145_s12  }
   0x8   : > { %p54_p0 = scmp.ne.s32.totalorder %s816_s13, %s812_s12  ;;  %p898_p1 = scmp.eq.s32.totalorder %s503_s18, 0 }
   0x9   : > { %p902_p2 = scmp.eq.s32.totalorder %s503_s18, 1  ;;  %p133_p3 = scmp.eq.s32.totalorder %s504_s19, 1 }
   0xa   : > { %s1132_s20 = scalar_select %p898_p1, 1, 0 }
   0xb   : > { %p908_p4 = por %p898_p1, %p54_p0  ;;  %p505_p5 = scmp.ge.s32.totalorder %s832_s17, 1 }
   0xc   : > { %p913_p6 = por %p133_p3, %p54_p0  ;;  %p140_p7 = scmp.lt.s32.totalorder %s832_s17, 3 }
   0xd   : > { %s1134_s22 = scalar_select %p908_p4, 1, 0 }
   0xe   : > { %s1135_s23 = scalar_select %p913_p6, 1, 0 }
   0xf   : > { %p918_p8 = pnand %p505_p5, %p140_p7  ;;  %s834_s25 = smov [#allocation5]  }
  0x10   : > { %s152_s26 = sshll.u32 %s834_s25, 4  ;;  %s835_s28 = smov [#allocation7]   ;;  %s922_s26 = int_to_ptr.vmem [resolvable:$true] %s152_s26 }
  0x11   : > { %p573_p9 = pneg %p918_p8  ;;  %s168_s29 = sshll.u32 %s835_s28, 4  ;;  %s933_s29 = int_to_ptr.vmem [resolvable:$true] %s168_s29 }
  0x12   : > { %s660_s5 = scalar_lea.hbm %s1125_s1, 1024 }
  0x13   : > { %p929_p11 = pnand %p573_p9, %p898_p1  ;;  %p661_p12 = scmp.ne.s32.totalorder %s1125_s1, %s660_s5 }
  0x14   : > { %p667_p5 = scmp.lt.u32.totalorder %s660_s5, %s1125_s1 }
  0x15   : > { %p662_p13 = pneg %p929_p11 }
  0x17   : > { %p663_p0 = pnand %p662_p13, %p661_p12 }
  0x19   : > { %p664_p3 = pneg %p663_p0 }
  0x1b   : > { %p669_p7 = pnand %p667_p5, %p664_p3 }
  0x1d   : > { %672 = shalt.err (!%p669_p7)
}
  0x1e   : > { %s673_s10 = scalar_lea.vmem %s922_s26, 1024  ;;  %p681_p1 = scmp.lt.s32.totalorder %s922_s26, %s922_s26 }
  0x1f   : > { %p674_p9 = scmp.ne.s32.totalorder %s922_s26, %s673_s10  ;;  %p682_p12 = scmp.lt.s32.totalorder %s673_s10, %s673_s10 }
  0x21   : > { %p676_p10 = pnand %p674_p9, %p662_p13  ;;  %p683_p0 = por %p682_p12, %p681_p1 }
  0x23   : > { %p677_p6 = pneg %p676_p10 }
  0x25   : > { %p684_p4 = pnand %p683_p0, %p677_p6 }
  0x27   : > { %687 = shalt.err (!%p684_p4)
}
  0x28   : > { %s836_s11 = smov 64   ;;  %s837_s18 = smov 4  }
  0x29   : > { %576 = dma.hbm_to_vmem [thread:$0]  (!%p929_p11), %s1125_s1, 1024, %s922_s26, [#allocation6], %s836_s11, %s836_s11, %s837_s18  }
  0x2a   : > { %s688_s4 = scalar_lea.hbm %s1126_s2, 384 }
  0x2b   : > { %p689_p1 = scmp.ne.s32.totalorder %s1126_s2, %s688_s4  ;;  %p695_p10 = scmp.lt.u32.totalorder %s688_s4, %s1126_s2 }
  0x2d   : > { %p691_p4 = pnand %p689_p1, %p662_p13 }
  0x2f   : > { %p692_p6 = pneg %p691_p4 }
  0x31   : > { %p697_p3 = pnand %p695_p10, %p692_p6 }
  0x33   : > { %700 = shalt.err (!%p697_p3)
}
  0x34   : > { %s701_s26 = scalar_lea.vmem %s933_s29, 384  ;;  %p709_p12 = scmp.lt.s32.totalorder %s933_s29, %s933_s29 }
  0x35   : > { %p702_p5 = scmp.ne.s32.totalorder %s933_s29, %s701_s26  ;;  %p710_p0 = scmp.lt.s32.totalorder %s701_s26, %s701_s26 }
  0x37   : > { %p704_p7 = pnand %p702_p5, %p662_p13  ;;  %p711_p1 = por %p710_p0, %p709_p12 }
  0x39   : > { %p705_p9 = pneg %p704_p7 }
  0x3b   : > { %p712_p4 = pnand %p711_p1, %p705_p9 }
  0x3d   : > { %715 = shalt.err (!%p712_p4)
}
  0x3e   : > { %s838_s9 = smov 128   ;;  %s839_s10 = smov 8  }
  0x3f   : > { %579 = dma.hbm_to_vmem [thread:$0]  (!%p929_p11), %s1126_s2, 384, %s933_s29, [#allocation6], %s838_s9, %s838_s9, %s839_s10  }
  0x40   : > { %s29_s28 = sadd.s32 1, %s828_s16  ;;  %s41_s30 = sadd.s32 1, %s820_s14 }
  0x41   : > { %p30_p13 = scmp.ge.s32.totalorder %s29_s28, 2  ;;  %p48_p6 = scmp.ne.s32.totalorder %s820_s14, %s816_s13 }
  0x42   : > { %p49_p10 = scmp.eq.s32.totalorder %s832_s17, 0  ;;  %p590_p3 = scmp.lt.s32.totalorder %s832_s17, 2 }
  0x43   : > { %s1151_s28 = smov (%p30_p13, %s29_s28), 0  ;;  %p1000_p7 = por %p902_p2, %p48_p6 }
  0x44   : > { %p50_p5 = por %p49_p10, %p48_p6  ;;  %s36_s27 = ssub.s32 %s828_s16, %s1151_s28 }
  0x45   : > { %s1138_s4 = scalar_select %p1000_p7, 1, 0 }
  0x46   : > { %s182_s5 = sand.u32 1, %s820_s14   ;;  %p39_p9 = scmp.eq.s32.totalorder %s36_s27, 0 }
  0x47   : > { %s556_s29 = smul.u32 12, %s182_s5  ;;  %p1007_p11 = pnand %p590_p3, %p50_p5 }
  0x48   : > { %s1012_s7 = scalar_select %p39_p9, %s820_s14, %s41_s30  }
  0x49   : > { %s557_s8 = smul.u32 192, %s828_s16  ;;  %s186_s26 = scalar_lea.vmem [#allocation2], %s556_s29 }
  0x4a   : > { %s195_s9 = sshll.u32 %s186_s26, 4  ;;  %s1022_s25 = scalar_lea.sflag [#allocation3], %s182_s5  ;;  %s1020_s9 = int_to_ptr.vmem [resolvable:$true] %s195_s9 }
  0x4b   : > { %s1018_s19 = scalar_lea.hbm %s1124_s0, %s557_s8  ;;  %p718_p12 = pneg %p1007_p11 }
  0x4c   : > { %s716_s27 = scalar_lea.hbm %s1018_s19, 192  ;;  %s721_s8 = scalar_lea.hbm %s1124_s0, 384 }
  0x4d   : > { %p717_p2 = scmp.ne.s32.totalorder %s1018_s19, %s716_s27  ;;  %p722_p4 = scmp.lt.u32.totalorder %s1018_s19, %s1124_s0 }
  0x4e   : > { %p723_p13 = scmp.lt.u32.totalorder %s721_s8, %s716_s27  ;;  %p725_p10 = scmp.lt.u32.totalorder %s716_s27, %s1018_s19 }
  0x4f   : > { %p719_p0 = pnand %p718_p12, %p717_p2 }
  0x50   : > { %p724_p6 = por %p723_p13, %p722_p4 }
  0x51   : > { %p720_p1 = pneg %p719_p0 }
  0x52   : > { %p726_p3 = por %p725_p10, %p724_p6 }
  0x54   : > { %p727_p5 = pnand %p726_p3, %p720_p1 }
  0x56   : > { %730 = shalt.err (!%p727_p5)
}
  0x57   : > { %s731_s5 = scalar_lea.vmem %s1020_s9, 192  ;;  %s840_s10 = smov [#allocation2]  }
  0x58   : > { %p732_p9 = scmp.ne.s32.totalorder %s1020_s9, %s731_s5  ;;  %s736_s30 = sshll.u32 %s840_s10, 4  ;;  %s737_s30 = int_to_ptr.vmem [resolvable:$false] %s736_s30 }
  0x59   : > { %s738_s29 = scalar_lea.vmem %s737_s30, 384  ;;  %p739_p7 = scmp.lt.s32.totalorder %s1020_s9, %s737_s30 }
  0x5a   : > { %p734_p2 = pnand %p732_p9, %p718_p12  ;;  %p740_p4 = scmp.lt.s32.totalorder %s738_s29, %s731_s5 }
  0x5c   : > { %p735_p0 = pneg %p734_p2  ;;  %p741_p13 = por %p740_p4, %p739_p7 }
  0x5e   : > { %p742_p6 = pnand %p741_p13, %p735_p0 }
  0x60   : > { %745 = shalt.err (!%p742_p6)
}
  0x61   : > { %583 = dma.hbm_to_vmem [thread:$0]  (!%p1007_p11), %s1018_s19, 192, %s1020_s9, %s1022_s25, %s836_s11, %s836_s11, %s837_s18  }
  0x62   : > { %207 = sbr.rel (%p918_p8) target bundleno = 374 (0x176), region = 32  ;;  %s1056_s27 = sand.u32 (!%p918_p8), 1, %s816_s13  }
  0x63   : > { %s558_s8 = smul.u32 (!%p918_p8), 12, %s1056_s27  ;;  %s210_s26 = scalar_lea.sflag (!%p918_p8), [#allocation3], %s1056_s27 }
  0x64   : > { %p1140_p7 = scmp.ne.s32.totalorder (!%p918_p8), %s1134_s22, 0 }
  0x65   : > { %s213_s21 = scalar_lea.vmem (!%p918_p8), [#allocation2], %s558_s8 }
  0x69   : > { %799 = dma.done.wait (%p1140_p7), %s210_s26, 192  }
  0x6a   : > { %801 = vsyncadd (%p1140_p7), %s210_s26, 4294967104  ;;  %p1141_p12 = scmp.ne.s32.totalorder %s1132_s20, 0 }
  0x6c   : > { %803 = dma.done.wait (%p1141_p12), [#allocation6], 1408  }
  0x6d   : > { %805 = vsyncadd (%p1141_p12), [#allocation6], 4294965888  ;;  %v650_v0 = vld [vmem:[#allocation5] sm:$0xff]   ;;  %v651_v1 = vld [vmem:[#allocation5 + $0x8] sm:$0xff]   ;;  %s559_s20 = smul.u32 24, %s1056_s27  ;;  %p1142_p11 = scmp.ne.s32.totalorder %s1138_s4, 0 }
  0x6e   : > { %536 = vmatprep.subr.bf16.mxu0 %v650_v0  ;;  %v652_v2 = vld [vmem:[#allocation5 + $0x10] sm:$0xff]   ;;  %v653_v3 = vld [vmem:[#allocation5 + $0x18] sm:$0xff]   ;;  %v654_v5 = vld [vmem:[#allocation5 + $0x20] sm:$0xff]   ;;  %s560_s11 = smul.u32 384, %s824_s15  ;;  %s380_s15 = scalar_lea.sflag [#allocation4], %s1056_s27 }
  0x6f   : > { %537 = vmatpush3.bf16.msra.mxu0 %v650_v0  ;;  %v658_v4 = vld [vmem:[%s213_s21] sm:$0xff]   ;;  %v659_v9 = vld [vmem:[%s213_s21 + $0x8] ss:$0 sps:$4 sm:$0xff]   ;;  %s243_s22 = scalar_lea.vmem [#allocation8], %s559_s20  ;;  %v267_v11 = vld [vmem:[#allocation7] sm:$0xff]  ;;  %s841_s25 = smov [#allocation8]  }
  0x70   : > { %538 = vmatprep.subr.bf16.mxu0 %v651_v1  ;;  %552 = vmatprep.mubr.bf16.mxu0 %v658_v4  ;;  %v655_v6 = vld [vmem:[#allocation5 + $0x28] sm:$0xff]   ;;  %v656_v7 = vld [vmem:[#allocation5 + $0x30] sm:$0xff]   ;;  %v657_v8 = vld [vmem:[#allocation5 + $0x38] sm:$0xff]   ;;  %s395_s24 = sshll.u32 %s243_s22, 4  ;;  %s1075_s9 = scalar_lea.hbm %s1127_s3, %s560_s11  ;;  %s1070_s24 = int_to_ptr.vmem [resolvable:$true] %s395_s24 }
  0x71   : > { %v269_v10 = vld [vmem:[#allocation7 + $0x10] sm:$0xff]  ;;  %v268_v15 = vld [vmem:[#allocation7 + $0x8] sm:$0xff]  ;;  %s746_s19 = scalar_lea.vmem %s1070_s24, 384  ;;  %s750_s5 = sshll.u32 %s841_s25, 4  ;;  %s751_s5 = int_to_ptr.vmem [resolvable:$false] %s750_s5 }
  0x72   : > { %p747_p8 = scmp.ne.s32.totalorder %s1070_s24, %s746_s19  ;;  %s752_s10 = scalar_lea.vmem %s751_s5, 768 }
  0x73   : > { %539 = vmatpush3.bf16.msra.mxu0 %v651_v1  ;;  %p753_p3 = scmp.lt.s32.totalorder %s1070_s24, %s751_s5  ;;  %p754_p5 = scmp.lt.s32.totalorder %s752_s10, %s746_s19 }
  0x74   : > { %540 = vmatprep.subr.bf16.mxu0 %v652_v2  ;;  %p748_p1 = pnand %p747_p8, %p1142_p11 }
  0x75   : > { %p755_p9 = por %p754_p5, %p753_p3 }
  0x76   : > { %p749_p10 = pneg %p748_p1 }
  0x77   : > { %541 = vmatpush3.bf16.msra.mxu0 %v652_v2 }
  0x78   : > { %542 = vmatprep.subr.bf16.mxu0 %v653_v3  ;;  %p756_p2 = pnand %p755_p9, %p749_p10 }
  0x7b   : > { %543 = vmatpush3.bf16.msra.mxu0 %v653_v3 }
  0x7c   : > { %544 = vmatprep.subr.bf16.mxu0 %v654_v5 }
  0x7f   : > { %545 = vmatpush3.bf16.msra.mxu0 %v654_v5 }
  0x80   : > { %546 = vmatprep.subr.bf16.mxu0 %v655_v6 }
  0x83   : > { %547 = vmatpush3.bf16.msra.mxu0 %v655_v6 }
  0x84   : > { %548 = vmatprep.subr.bf16.mxu0 %v656_v7 }
  0x87   : > { %549 = vmatpush3.bf16.msra.mxu0 %v656_v7 }
  0x88   : > { %550 = vmatprep.subr.bf16.mxu0 %v657_v8 }
  0x8b   : > { %551 = vmatpush3.bf16.msra.mxu0 %v657_v8 }
  0x8e   : > { %553 = vmatmul.mubr.bf16.vlgmr.msra.gmra.mrb[0].mxu0 %v659_v9 }
 0x161   : > { %v554_v12 = vpop.f32.mrb[0].mxu0 }
 0x162   : > { %v371_v13 = vadd.f32 %v554_v12, %v269_v10  ;;  %v362_v14 = vpop.f32.mrb[1].mxu0 }
 0x163   : > { %v363_v16 = vadd.f32 %v362_v14, %v267_v11  ;;  %v555_v17 = vpop.f32.mrb[2].mxu0 }
 0x164   : > { %378 = vst [vmem:[%s243_s22 + $0x10] sm:$0xff] %v371_v13  ;;  %v365_v18 = vpop.f32.mrb[3].mxu0 }
 0x165   : > { %376 = vst [vmem:[%s243_s22] sm:$0xff] %v363_v16  ;;  %v366_v19 = vadd.f32 %v365_v18, %v268_v15 }
 0x167   : > { %377 = vst [vmem:[%s243_s22 + $0x8] sm:$0xff] %v366_v19 }
 0x168   : > { %759 = shalt.err (!%p756_p2)
}
 0x169   : > { %s760_s30 = scalar_lea.hbm %s1075_s9, 384  ;;  %s764_s26 = scalar_lea.hbm %s1127_s3, 768 }
 0x16a   : > { %p761_p0 = scmp.ne.s32.totalorder %s1075_s9, %s760_s30  ;;  %p765_p6 = scmp.lt.u32.totalorder %s1075_s9, %s1127_s3 }
 0x16b   : > { %p766_p7 = scmp.lt.u32.totalorder %s764_s26, %s760_s30  ;;  %p768_p8 = scmp.lt.u32.totalorder %s760_s30, %s1075_s9 }
 0x16c   : > { %p762_p4 = pnand %p761_p0, %p1142_p11 }
 0x16d   : > { %p767_p12 = por %p766_p7, %p765_p6 }
 0x16e   : > { %p763_p13 = pneg %p762_p4 }
 0x16f   : > { %p769_p1 = por %p768_p8, %p767_p12 }
 0x171   : > { %p770_p10 = pnand %p769_p1, %p763_p13 }
 0x173   : > { %773 = shalt.err (!%p770_p10)
}
 0x174   : > { %s842_s22 = smov 128   ;;  %s843_s11 = smov 8  }
 0x175   : > { %571 = dma.vmem_to_hbm [thread:$0]  (%p1142_p11), %s1070_s24, 384, %s1075_s9, %s380_s15, %s842_s22, %s842_s22, %s843_s11  }
 0x176 PF: > { %s410_s18 = sand.u32 1, %s812_s12   ;;  %p1143_p3 = scmp.ne.s32.totalorder %s1135_s23, 0 }
 0x177   : > { %p1144_p5 = scmp.ge.s32.totalorder %s832_s17, 2  ;;  %s411_s6 = scalar_lea.sflag [#allocation4], %s410_s18 }
 0x179   : > { %p585_p9 = pnand %p1144_p5, %p1143_p3 }
 0x17b   : > { %807 = dma.done.wait (!%p585_p9), %s411_s6, 384  }
 0x17c   : > { %809 = vsyncadd (!%p585_p9), %s411_s6, 4294966912  ;;  %s20_s17 = sadd.s32 1, %s832_s17   ;;  %s1145_s12 = smov %s816_s13 }
 0x17d   : > { %p17_p2 = scmp.ge.s32.totalorder %s20_s17, 4   ;;  %s1146_s13 = smov %s820_s14 }
 0x17e   : > { %s1147_s14 = smov %s1012_s7  ;;  %s1148_s15 = smov %s828_s16 }
 0x17f   : > { %s1149_s16 = smov %s1151_s28  ;;  %19 = sbr.rel (!%p17_p2) target bundleno = 7 (0x7), region = 86 }
 0x186   :  { %416 = vsyncpa [#allocation3], 1 }
 0x187   :  { %418 = vsyncpa [#allocation3 + $0x1], 1 }
 0x188   :  { %419 = vsyncpa [#allocation6], 1 }
 0x189   :  { %420 = vsyncpa [#allocation4], 1 }
 0x18a   :  { %422 = vsyncpa [#allocation4 + $0x1], 1 }

</bundles_post_ra>
